<compile_context>
chip_gen: v7x
topology: tpu7x:2x2x1
jax: 0.10.0
libtpu: 0.0.40
codegen_flags: <defaults>
</compile_context>

<pallas_src>
import functools

import jax
import jax.numpy as jnp
from jax import lax
from jax.experimental import pallas as pl
from jax.experimental.pallas import tpu as pltpu

_MIB = 1024 * 1024


# ----------------------------------------------------------------------------
# in-kernel helpers
# ----------------------------------------------------------------------------
def _topk_mask(logits_f32, k):
    """{0,1} float32 mask marking the top-k entries per row.

    Tie-break: lower index wins (matches torch.topk / lax.top_k).  `k` is a
    static Python int, so the loop unrolls at trace time.
    """
    rows, n_exp = logits_f32.shape
    idx = lax.broadcasted_iota(jnp.int32, (rows, n_exp), 1)
    mask = jnp.zeros((rows, n_exp), jnp.float32)
    work = logits_f32
    for _ in range(k):
        row_max = jnp.max(work, axis=-1, keepdims=True)
        is_max = work == row_max
        cand = jnp.where(is_max, idx, n_exp)          # lowest index among maxima
        sel_idx = jnp.min(cand, axis=-1, keepdims=True)
        sel = idx == sel_idx
        mask = jnp.where(sel, 1.0, mask)
        work = jnp.where(sel, -jnp.inf, work)
    return mask


def _dynamic_gate_kernel(x_ref, wt_ref, out_ref, *, num_selects, num_experts,
                         precision):
    # logits = x @ W^T with W pre-transposed to [H, E_pad]: contraction is
    # (lhs dim 1, rhs dim 0), so the MXU sees the weight in natural layout.
    logits = jnp.dot(x_ref[...], wt_ref[...],
                     preferred_element_type=jnp.float32, precision=precision)
    e_pad = logits.shape[-1]
    if e_pad != num_experts:
        # Padded expert columns can never be selected.
        col = lax.broadcasted_iota(jnp.int32, logits.shape, 1)
        logits = jnp.where(col < num_experts, logits, -jnp.inf)
    # NOTE: softmax intentionally omitted (monotone per row -> same top-k set).
    out_ref[...] = _topk_mask(logits, num_selects).astype(out_ref.dtype)


# ----------------------------------------------------------------------------
# tiling helpers
# ----------------------------------------------------------------------------
def _tpu_memory_model():
    """Best-effort (never raises) per-TensorCore VMEM capacity and TC count."""
    vmem_cap = 64 * _MIB          # strictest of v5e/v6e/v7x
    num_cores = 0
    try:
        info = pltpu.get_tpu_info()
        cap = getattr(info, "vmem_capacity_bytes", None)
        if cap:
            vmem_cap = int(cap)
        for attr in ("num_tensorcores", "tensorcore_count", "num_cores",
                     "core_count"):
            val = getattr(info, attr, None)
            if isinstance(val, int) and val > 0:
                num_cores = val
                break
    except Exception:
        pass
    if num_cores <= 0:
        # Among v5e/v6e/v7x, only v7x (64 MiB/TC) is a 2-TensorCore chip.
        num_cores = 2 if vmem_cap <= 80 * _MIB else 1
    return vmem_cap, num_cores


def _choose_block_b(B, budget_rows, sublane, num_cores):
    """Pick a sublane-aligned row tile.

    * 1-TC chips (v5e/v6e): the largest tile that fits the budget -- a single
      full-batch tile (grid of 1) when it fits (per-step overhead ~0.35 us).
    * 2-TC chips (v7x): round the tile count up to a multiple of the core
      count and use near-equal tiles so dimension_semantics=('parallel',)
      splits the batch evenly across TensorCores (no ragged / odd grid).
    """
    if budget_rows >= B and num_cores <= 1:
        return B
    n_tiles = -(-B // min(budget_rows, B))           # tiles forced by VMEM budget
    if num_cores > 1:
        n_tiles = -(-max(n_tiles, num_cores) // num_cores) * num_cores
    bb = -(-B // n_tiles)                            # near-equal rows per tile
    bb = -(-bb // sublane) * sublane                 # sublane aligned
    bb = min(bb, budget_rows)
    return B if bb >= B else bb


# ----------------------------------------------------------------------------
# wrappers
# ----------------------------------------------------------------------------
def topk_gate_dynamic(routing_inputs, gate_weight, num_selects, *, block_b=None):
    """Example-conditioned routing (static=False, eval mode).

    routing_inputs: [B, H]  (f32 or bf16 -- streamed in its native dtype)
    gate_weight:    [E, H]  (nn.Linear(hidden, num_experts, bias=False).weight)
    returns expert_weights [B, E] with exactly `num_selects` ones per row.
    """
    B, H = routing_inputs.shape
    E, H2 = gate_weight.shape
    assert H == H2
    assert 1 <= num_selects <= E, "num_selects must be in [1, num_experts]"

    x = routing_inputs
    out_dtype = x.dtype
    x_itemsize = jnp.dtype(x.dtype).itemsize
    out_itemsize = jnp.dtype(out_dtype).itemsize
    sublane = 16 if x_itemsize == 2 else 8

    # Lane-dense expert axis: pad E up to a multiple of 128 so the top-k vregs
    # and the output stores use all 128 lanes (padded columns masked in-kernel).
    E_pad = int(pl.cdiv(E, 128) * 128)

    # Weight: transpose once to [H, E], pad, match x's streaming dtype.
    # In production, store it pre-transposed / pre-padded / pre-cast.
    w_t = gate_weight.T
    if E_pad != E:
        w_t = jnp.pad(w_t, ((0, 0), (0, E_pad - E)))
    if w_t.dtype != x.dtype:
        w_t = w_t.astype(x.dtype)
    w_itemsize = jnp.dtype(w_t.dtype).itemsize

    # Default MXU precision truncates f32 operands to bf16; the kernel is
    # HBM-bound so the extra passes for HIGHEST are hidden, and they keep
    # top-k selection parity with an fp32 reference.
    precision = lax.Precision.HIGHEST if x.dtype == jnp.float32 else None

    # ---- per-chip VMEM budget ----
    vmem_cap, num_cores = _tpu_memory_model()
    limit_cap = max(min(vmem_cap - 8 * _MIB, 112 * _MIB), 24 * _MIB)
    budget = limit_cap - 6 * _MIB

    # VMEM per batch row: double-buffered x tile + double-buffered out tile +
    # ~6 live [rows, E_pad] f32 slabs from the unrolled top-k (logits / work /
    # mask / idx + temporaries).
    per_row = 2 * H * x_itemsize + 2 * E_pad * out_itemsize + 6 * E_pad * 4
    weight_bytes = 1 * H * E_pad * w_itemsize        # single-buffered, invariant
    budget_rows = (budget - weight_bytes) // per_row
    budget_rows = max(sublane, (budget_rows // sublane) * sublane)

    if block_b is None:
        block_b = _choose_block_b(B, budget_rows, sublane, num_cores)
    else:
        assert block_b == B or block_b % sublane == 0, (
            f"block_b must equal B or be a multiple of {sublane} for this dtype")
        block_b = min(block_b, B)
    grid_b = int(pl.cdiv(B, block_b))

    # Tiny tiles (large H) expose DMA issue latency: give x a third buffer.
    x_buffers = 3 if (block_b <= 64 and grid_b > 1) else 2

    kernel = functools.partial(_dynamic_gate_kernel, num_selects=num_selects,
                               num_experts=E, precision=precision)
    cost = pl.CostEstimate(
        flops=2 * B * H * E_pad,
        transcendentals=0,
        bytes_accessed=(B * H * x_itemsize + H * E_pad * w_itemsize
                        + B * E_pad * out_itemsize))

    def build(use_pipeline_modes):
        w_bufs = 1 if use_pipeline_modes else 2
        n_x_bufs = x_buffers if use_pipeline_modes else 2
        vmem_need = (n_x_bufs * block_b * H * x_itemsize
                     + 2 * block_b * E_pad * out_itemsize
                     + w_bufs * H * E_pad * w_itemsize
                     + 6 * block_b * E_pad * 4)
        vmem_limit = int(min(limit_cap, max(vmem_need + 6 * _MIB, 16 * _MIB)))
        if use_pipeline_modes:
            x_spec = pl.BlockSpec((block_b, H), lambda i: (i, 0),
                                  pipeline_mode=pl.Buffered(n_x_bufs))
            w_spec = pl.BlockSpec((H, E_pad), lambda i: (0, 0),
                                  pipeline_mode=pl.Buffered(1))
        else:
            x_spec = pl.BlockSpec((block_b, H), lambda i: (i, 0))
            w_spec = pl.BlockSpec((H, E_pad), lambda i: (0, 0))
        return pl.pallas_call(
            kernel,
            out_shape=jax.ShapeDtypeStruct((B, E_pad), out_dtype),
            grid_spec=pltpu.PrefetchScalarGridSpec(
                num_scalar_prefetch=0,
                grid=(grid_b,),
                in_specs=[x_spec, w_spec],
                out_specs=pl.BlockSpec((block_b, E_pad), lambda i: (i, 0)),
            ),
            compiler_params=pltpu.CompilerParams(
                dimension_semantics=("parallel",),
                vmem_limit_bytes=vmem_limit,
            ),
            cost_estimate=cost,
        )

    try:
        out_padded = build(True)(x, w_t)
    except Exception:
        # Fallback for jax builds that reject pipeline_mode / pl.Buffered(1):
        # default double-buffering (correct, slightly more VMEM).
        out_padded = build(False)(x, w_t)

    return out_padded if E_pad == E else out_padded[:, :E]


def topk_gate_static(w_logits, num_selects):
    """Task-level routing (static=True, eval mode). w_logits: [E].

    Left in plain XLA on purpose: a 1xE kernel is dominated by launch / DMA
    setup overhead; XLA fuses this into neighboring ops for free.
    """
    E = w_logits.shape[0]
    assert 1 <= num_selects <= E
    _, idx = lax.top_k(w_logits, num_selects)
    return jnp.zeros((E,), w_logits.dtype).at[idx].set(1.0)


def topk_gate_forward(routing_inputs, params, *, num_selects, static):
    """Mirrors TopKGate.forward: returns (None, expert_weights)."""
    if static:
        expert_weights = topk_gate_static(params["w_logits"], num_selects)
    else:
        expert_weights = topk_gate_dynamic(routing_inputs, params["gate_weight"],
                                           num_selects)
    return None, expert_weights


# ----------------------------------------------------------------------------
# demo / self-check
# ----------------------------------------------------------------------------
if __name__ == "__main__":
    B, H, E, K = 8, 32, 8, 2

    key = jax.random.PRNGKey(0)
    k_x, k_w, k_s, k_x2 = jax.random.split(key, 4)

    routing_inputs = jax.random.normal(k_x, (B, H), dtype=jnp.float32)
    gate_weight = 0.001 * jax.random.normal(k_w, (E, H), dtype=jnp.float32)  # [E, H]
    w_logits_static = 0.001 * jax.random.normal(k_s, (E,), dtype=jnp.float32)
    params = {"gate_weight": gate_weight, "w_logits": w_logits_static}

    def ref_dynamic(x, w, k):
        logits = jnp.dot(x.astype(jnp.float32), w.astype(jnp.float32).T,
                         precision=lax.Precision.HIGHEST)
        probs = jax.nn.softmax(logits, axis=1)
        _, idx = lax.top_k(probs, k)
        return jnp.sum(jax.nn.one_hot(idx, w.shape[0], dtype=jnp.float32), axis=1)

    # --- dynamic (static=False) path, f32 ---
    _, ew_dyn = topk_gate_forward(routing_inputs, params, num_selects=K, static=False)
    ew_dyn = jax.block_until_ready(ew_dyn)
    ew_ref = ref_dynamic(routing_inputs, gate_weight, K)
    assert ew_dyn.shape == (B, E)
    assert jnp.allclose(ew_dyn.astype(jnp.float32), ew_ref), "dynamic gate mismatch"
    assert jnp.all(jnp.sum(ew_dyn.astype(jnp.float32), axis=1) == K)

    # --- dynamic path with a batch that does NOT divide the block (cdiv grid) ---
    B2 = 20
    x2 = jax.random.normal(k_x2, (B2, H), dtype=jnp.float32)
    ew_part = jax.block_until_ready(topk_gate_dynamic(x2, gate_weight, K, block_b=16))
    assert ew_part.shape == (B2, E)
    assert jnp.allclose(ew_part.astype(jnp.float32), ref_dynamic(x2, gate_weight, K)), \
        "partial-block mismatch"
    assert jnp.all(jnp.sum(ew_part.astype(jnp.float32), axis=1) == K)

    # --- bf16-native streaming (inputs arrive already in bf16; structural
    #     checks only, since bf16 can flip near-tie logits vs f32 reference) ---
    x_bf16 = routing_inputs.astype(jnp.bfloat16)
    ew_bf = jax.block_until_ready(topk_gate_dynamic(x_bf16, gate_weight, K))
    assert ew_bf.shape == (B, E)
    assert jnp.all(jnp.sum(ew_bf.astype(jnp.float32), axis=1) == K)
    assert jnp.all((ew_bf == 0) | (ew_bf == 1))

    # --- static (static=True) path ---
    _, ew_stat = topk_gate_forward(None, params, num_selects=K, static=True)
    ew_stat = jax.block_until_ready(ew_stat)
    _, sidx_ref = lax.top_k(w_logits_static, K)
    ew_stat_ref = jnp.sum(jax.nn.one_hot(sidx_ref, E, dtype=jnp.float32), axis=0)
    assert ew_stat.shape == (E,)
    assert jnp.allclose(ew_stat, ew_stat_ref), "static gate mismatch"
    assert jnp.sum(ew_stat) == K

    print("KERNEL_OK")
</pallas_src>

<mosaic_0001>
module attributes {stable_mosaic.version = 11 : i64} {
  func.func @_dynamic_gate_kernel(%arg0: i32, %arg1: memref<8x32xf32, #tpu.memory_space<vmem>>, %arg2: memref<32x128xf32, #tpu.memory_space<vmem>>, %arg3: memref<8x128xf32, #tpu.memory_space<vmem>>) attributes {dimension_semantics = [#tpu.dimension_semantics<parallel>], iteration_bounds = array<i64: 1>, scalar_prefetch = 0 : i64, scratch_operands = 0 : i64, tpu.core_type = #tpu.core_type<tc>, window_params = [{pipeline_mode = #tpu.pipeline_mode<double_buffered>, transform_indices = @transform_0, window_bounds = array<i64: 8, 32>}, {pipeline_mode = #tpu.pipeline_mode<synchronous>, transform_indices = @transform_1, window_bounds = array<i64: 32, 128>}, {transform_indices = @transform_2, window_bounds = array<i64: 8, 128>}]} {
    %c0 = arith.constant 0 : index
    %c0_0 = arith.constant 0 : index
    %0 = vector.load %arg1[%c0, %c0_0] : memref<8x32xf32, #tpu.memory_space<vmem>>, vector<8x32xf32>
    %c0_1 = arith.constant 0 : index
    %c0_2 = arith.constant 0 : index
    %1 = vector.load %arg2[%c0_1, %c0_2] : memref<32x128xf32, #tpu.memory_space<vmem>>, vector<32x128xf32>
    %cst = arith.constant dense<0.000000e+00> : vector<8x128xf32>
    %2 = tpu.matmul %0, %1, %cst {dimension_numbers = #tpu.dot_dimension_numbers<[1], [0], [0], [1], [0, 0, 1, 1], [], []>, precision = #tpu.contract_precision<fp32>} : vector<8x32xf32>, vector<32x128xf32>, vector<8x128xf32> -> vector<8x128xf32>
    %3 = tpu.iota {dimensions = array<i32: 1>} : vector<8x128xi32>
    %c8_i32 = arith.constant 8 : i32
    %4 = vector.broadcast %c8_i32 : i32 to vector<8x128xi32>
    %5 = arith.cmpi slt, %3, %4 : vector<8x128xi32>
    %cst_3 = arith.constant 0xFF800000 : f32
    %6 = vector.broadcast %cst_3 : f32 to vector<8x128xf32>
    %7 = arith.select %5, %2, %6 : vector<8x128xi1>, vector<8x128xf32>
    %8 = tpu.iota {dimensions = array<i32: 1>} : vector<8x128xi32>
    %cst_4 = arith.constant 0.000000e+00 : f32
    %9 = vector.broadcast %cst_4 : f32 to vector<8x128xf32>
    %cst_5 = arith.constant dense<0xFF800000> : vector<8xf32>
    %10 = vector.multi_reduction <maximumf>, %7, %cst_5 [1] : vector<8x128xf32> to vector<8xf32>
    %11 = vector.shape_cast %10 : vector<8xf32> to vector<8x1xf32>
    %12 = vector.broadcast %11 : vector<8x1xf32> to vector<8x128xf32>
    %13 = arith.cmpf oeq, %7, %12 : vector<8x128xf32>
    %c128_i32 = arith.constant 128 : i32
    %14 = vector.broadcast %c128_i32 : i32 to vector<8x128xi32>
    %15 = arith.select %13, %8, %14 : vector<8x128xi1>, vector<8x128xi32>
    %cst_6 = arith.constant dense<2147483647> : vector<8xi32>
    %16 = vector.multi_reduction <minsi>, %15, %cst_6 [1] : vector<8x128xi32> to vector<8xi32>
    %17 = vector.shape_cast %16 : vector<8xi32> to vector<8x1xi32>
    %18 = vector.broadcast %17 : vector<8x1xi32> to vector<8x128xi32>
    %19 = arith.cmpi eq, %8, %18 : vector<8x128xi32>
    %cst_7 = arith.constant 1.000000e+00 : f32
    %20 = vector.broadcast %cst_7 : f32 to vector<8x128xf32>
    %21 = arith.select %19, %20, %9 : vector<8x128xi1>, vector<8x128xf32>
    %cst_8 = arith.constant 0xFF800000 : f32
    %22 = vector.broadcast %cst_8 : f32 to vector<8x128xf32>
    %23 = arith.select %19, %22, %7 : vector<8x128xi1>, vector<8x128xf32>
    %cst_9 = arith.constant dense<0xFF800000> : vector<8xf32>
    %24 = vector.multi_reduction <maximumf>, %23, %cst_9 [1] : vector<8x128xf32> to vector<8xf32>
    %25 = vector.shape_cast %24 : vector<8xf32> to vector<8x1xf32>
    %26 = vector.broadcast %25 : vector<8x1xf32> to vector<8x128xf32>
    %27 = arith.cmpf oeq, %23, %26 : vector<8x128xf32>
    %c128_i32_10 = arith.constant 128 : i32
    %28 = vector.broadcast %c128_i32_10 : i32 to vector<8x128xi32>
    %29 = arith.select %27, %8, %28 : vector<8x128xi1>, vector<8x128xi32>
    %cst_11 = arith.constant dense<2147483647> : vector<8xi32>
    %30 = vector.multi_reduction <minsi>, %29, %cst_11 [1] : vector<8x128xi32> to vector<8xi32>
    %31 = vector.shape_cast %30 : vector<8xi32> to vector<8x1xi32>
    %32 = vector.broadcast %31 : vector<8x1xi32> to vector<8x128xi32>
    %33 = arith.cmpi eq, %8, %32 : vector<8x128xi32>
    %cst_12 = arith.constant 1.000000e+00 : f32
    %34 = vector.broadcast %cst_12 : f32 to vector<8x128xf32>
    %35 = arith.select %33, %34, %21 : vector<8x128xi1>, vector<8x128xf32>
    %c0_13 = arith.constant 0 : index
    %c0_14 = arith.constant 0 : index
    %36 = vector.load %arg3[%c0_13, %c0_14] : memref<8x128xf32, #tpu.memory_space<vmem>>, vector<8x128xf32>
    tpu.vector_store %arg3[%c0_13, %c0_14], %35 {strides = array<i32>} : memref<8x128xf32, #tpu.memory_space<vmem>>, vector<8x128xf32>,
    return
  }
  func.func @transform_0(%arg0: i32) -> (i32, i32) {
    %c0_i32 = arith.constant 0 : i32
    %c0_i32_0 = arith.constant 0 : i32
    return %arg0, %c0_i32 : i32, i32
  }
  func.func @transform_1(%arg0: i32) -> (i32, i32) {
    %c0_i32 = arith.constant 0 : i32
    %c0_i32_0 = arith.constant 0 : i32
    %c0_i32_1 = arith.constant 0 : i32
    return %c0_i32, %c0_i32_0 : i32, i32
  }
  func.func @transform_2(%arg0: i32) -> (i32, i32) {
    %c0_i32 = arith.constant 0 : i32
    %c0_i32_0 = arith.constant 0 : i32
    return %arg0, %c0_i32 : i32, i32
  }
}

module attributes {stable_mosaic.version = 11 : i64} {
  func.func @_dynamic_gate_kernel(%arg0: i32, %arg1: memref<8x32xf32, #tpu.memory_space<vmem>>, %arg2: memref<32x128xf32, #tpu.memory_space<vmem>>, %arg3: memref<8x128xf32, #tpu.memory_space<vmem>>) attributes {dimension_semantics = [#tpu.dimension_semantics<parallel>], iteration_bounds = array<i64: 1>, scalar_prefetch = 0 : i64, scratch_operands = 0 : i64, tpu.core_type = #tpu.core_type<tc>, window_params = [{transform_indices = @transform_0, window_bounds = array<i64: 8, 32>}, {pipeline_mode = #tpu.pipeline_mode<synchronous>, transform_indices = @transform_1, window_bounds = array<i64: 32, 128>}, {transform_indices = @transform_2, window_bounds = array<i64: 8, 128>}]} {
    %c0 = arith.constant 0 : index
    %c0_0 = arith.constant 0 : index
    %0 = vector.load %arg1[%c0, %c0_0] : memref<8x32xf32, #tpu.memory_space<vmem>>, vector<8x32xf32>
    %c0_1 = arith.constant 0 : index
    %c0_2 = arith.constant 0 : index
    %1 = vector.load %arg2[%c0_1, %c0_2] : memref<32x128xf32, #tpu.memory_space<vmem>>, vector<32x128xf32>
    %cst = arith.constant dense<0.000000e+00> : vector<8x128xf32>
    %2 = tpu.matmul %0, %1, %cst {dimension_numbers = #tpu.dot_dimension_numbers<[1], [0], [0], [1], [0, 0, 1, 1], [], []>, precision = #tpu.contract_precision<fp32>} : vector<8x32xf32>, vector<32x128xf32>, vector<8x128xf32> -> vector<8x128xf32>
    %3 = tpu.iota {dimensions = array<i32: 1>} : vector<8x128xi32>
    %c8_i32 = arith.constant 8 : i32
    %4 = vector.broadcast %c8_i32 : i32 to vector<8x128xi32>
    %5 = arith.cmpi slt, %3, %4 : vector<8x128xi32>
    %cst_3 = arith.constant 0xFF800000 : f32
    %6 = vector.broadcast %cst_3 : f32 to vector<8x128xf32>
    %7 = arith.select %5, %2, %6 : vector<8x128xi1>, vector<8x128xf32>
    %8 = tpu.iota {dimensions = array<i32: 1>} : vector<8x128xi32>
    %cst_4 = arith.constant 0.000000e+00 : f32
    %9 = vector.broadcast %cst_4 : f32 to vector<8x128xf32>
    %cst_5 = arith.constant dense<0xFF800000> : vector<8xf32>
    %10 = vector.multi_reduction <maximumf>, %7, %cst_5 [1] : vector<8x128xf32> to vector<8xf32>
    %11 = vector.shape_cast %10 : vector<8xf32> to vector<8x1xf32>
    %12 = vector.broadcast %11 : vector<8x1xf32> to vector<8x128xf32>
    %13 = arith.cmpf oeq, %7, %12 : vector<8x128xf32>
    %c128_i32 = arith.constant 128 : i32
    %14 = vector.broadcast %c128_i32 : i32 to vector<8x128xi32>
    %15 = arith.select %13, %8, %14 : vector<8x128xi1>, vector<8x128xi32>
    %cst_6 = arith.constant dense<2147483647> : vector<8xi32>
    %16 = vector.multi_reduction <minsi>, %15, %cst_6 [1] : vector<8x128xi32> to vector<8xi32>
    %17 = vector.shape_cast %16 : vector<8xi32> to vector<8x1xi32>
    %18 = vector.broadcast %17 : vector<8x1xi32> to vector<8x128xi32>
    %19 = arith.cmpi eq, %8, %18 : vector<8x128xi32>
    %cst_7 = arith.constant 1.000000e+00 : f32
    %20 = vector.broadcast %cst_7 : f32 to vector<8x128xf32>
    %21 = arith.select %19, %20, %9 : vector<8x128xi1>, vector<8x128xf32>
    %cst_8 = arith.constant 0xFF800000 : f32
    %22 = vector.broadcast %cst_8 : f32 to vector<8x128xf32>
    %23 = arith.select %19, %22, %7 : vector<8x128xi1>, vector<8x128xf32>
    %cst_9 = arith.constant dense<0xFF800000> : vector<8xf32>
    %24 = vector.multi_reduction <maximumf>, %23, %cst_9 [1] : vector<8x128xf32> to vector<8xf32>
    %25 = vector.shape_cast %24 : vector<8xf32> to vector<8x1xf32>
    %26 = vector.broadcast %25 : vector<8x1xf32> to vector<8x128xf32>
    %27 = arith.cmpf oeq, %23, %26 : vector<8x128xf32>
    %c128_i32_10 = arith.constant 128 : i32
    %28 = vector.broadcast %c128_i32_10 : i32 to vector<8x128xi32>
    %29 = arith.select %27, %8, %28 : vector<8x128xi1>, vector<8x128xi32>
    %cst_11 = arith.constant dense<2147483647> : vector<8xi32>
    %30 = vector.multi_reduction <minsi>, %29, %cst_11 [1] : vector<8x128xi32> to vector<8xi32>
    %31 = vector.shape_cast %30 : vector<8xi32> to vector<8x1xi32>
    %32 = vector.broadcast %31 : vector<8x1xi32> to vector<8x128xi32>
    %33 = arith.cmpi eq, %8, %32 : vector<8x128xi32>
    %cst_12 = arith.constant 1.000000e+00 : f32
    %34 = vector.broadcast %cst_12 : f32 to vector<8x128xf32>
    %35 = arith.select %33, %34, %21 : vector<8x128xi1>, vector<8x128xf32>
    %c0_13 = arith.constant 0 : index
    %c0_14 = arith.constant 0 : index
    %36 = vector.load %arg3[%c0_13, %c0_14] : memref<8x128xf32, #tpu.memory_space<vmem>>, vector<8x128xf32>
    tpu.vector_store %arg3[%c0_13, %c0_14], %35 {strides = array<i32>} : memref<8x128xf32, #tpu.memory_space<vmem>>, vector<8x128xf32>,
    return
  }
  func.func @transform_0(%arg0: i32) -> (i32, i32) {
    %c0_i32 = arith.constant 0 : i32
    %c0_i32_0 = arith.constant 0 : i32
    return %arg0, %c0_i32 : i32, i32
  }
  func.func @transform_1(%arg0: i32) -> (i32, i32) {
    %c0_i32 = arith.constant 0 : i32
    %c0_i32_0 = arith.constant 0 : i32
    %c0_i32_1 = arith.constant 0 : i32
    return %c0_i32, %c0_i32_0 : i32, i32
  }
  func.func @transform_2(%arg0: i32) -> (i32, i32) {
    %c0_i32 = arith.constant 0 : i32
    %c0_i32_0 = arith.constant 0 : i32
    return %arg0, %c0_i32 : i32, i32
  }
}

</mosaic_0001>

<bundles_post_ra>
// kernel: tpu_custom_call.1
= control target key start
LH: loop header
LB: loop body
LE: loop exit
PB: predicated region body
PF: predicated region fallthrough
CT: control target
= control target key end

     0   :  { %7 = vsyncpa [#allocation3], 0  ;;  %s908_s0 = inlined_call_operand.hbm [shape: f32[8,32], index: 0, kind: input, shape index: {}]   ;;  %s909_s1 = inlined_call_operand.hbm [shape: f32[32,128], index: 1, kind: input, shape index: {}]   ;;  %s910_s2 = inlined_call_operand.hbm [shape: f32[8,128], index: 2, kind: output, shape index: {}]  }
   0x1   :  { %8 = vsyncpa [#allocation6], 0 }
   0x2   :  { %9 = vsyncpa [#allocation4], 0  ;;  %s815_s9 = smov [#allocation2]   ;;  %s816_s11 = smov [#allocation5]  }
   0x3   :  { %s16_s10 = sshll.u32 %s815_s9, 4  ;;  %s25_s12 = sshll.u32 %s816_s11, 4  ;;  %s17_s10 = int_to_ptr.vmem [resolvable:$true] %s16_s10  ;;  %s838_s12 = int_to_ptr.vmem [resolvable:$true] %s25_s12 }
   0x4   :  { %s743_s15 = scalar_lea.hbm %s908_s0, 128 }
   0x5   :  { %p744_p0 = scmp.ne.s32.totalorder %s908_s0, %s743_s15  ;;  %p747_p1 = scmp.lt.u32.totalorder %s743_s15, %s908_s0 }
   0x7   :  { %p749_p2 = pnand %p747_p1, %p744_p0 }
   0x9   :  { %752 = shalt.err (!%p749_p2)
}
   0xa   :  { %s753_s20 = scalar_lea.vmem %s17_s10, 128  ;;  %p758_p4 = scmp.lt.s32.totalorder %s17_s10, %s17_s10 }
   0xb   :  { %p754_p3 = scmp.ne.s32.totalorder %s17_s10, %s753_s20  ;;  %p759_p5 = scmp.lt.s32.totalorder %s753_s20, %s753_s20 }
   0xd   :  { %p760_p6 = por %p759_p5, %p758_p4 }
   0xf   :  { %p761_p7 = pnand %p760_p6, %p754_p3 }
  0x11   :  { %764 = shalt.err (!%p761_p7)
}
  0x12   :  { %19 = dma.hbm_to_vmem [thread:$0]  %s908_s0, 128, %s17_s10, [#allocation3]  }
  0x13   :  { %s765_s25 = scalar_lea.hbm %s909_s1, 512 }
  0x14   :  { %p766_p8 = scmp.ne.s32.totalorder %s909_s1, %s765_s25  ;;  %p769_p9 = scmp.lt.u32.totalorder %s765_s25, %s909_s1 }
  0x16   :  { %p771_p10 = pnand %p769_p9, %p766_p8 }
  0x18   :  { %774 = shalt.err (!%p771_p10)
}
  0x19   :  { %s775_s30 = scalar_lea.vmem %s838_s12, 512  ;;  %p780_p12 = scmp.lt.s32.totalorder %s838_s12, %s838_s12 }
  0x1a   :  { %p776_p11 = scmp.ne.s32.totalorder %s838_s12, %s775_s30  ;;  %p781_p13 = scmp.lt.s32.totalorder %s775_s30, %s775_s30 }
  0x1c   :  { %p782_p0 = por %p781_p13, %p780_p12 }
  0x1e   :  { %p783_p1 = pnand %p782_p0, %p776_p11 }
  0x20   :  { %786 = shalt.err (!%p783_p1)
}
  0x21   :  { %s817_s0 = smov 128   ;;  %s818_s3 = smov 8  }
  0x22   :  { %31 = dma.hbm_to_vmem [thread:$0]  %s909_s1, 512, %s838_s12, [#allocation6], %s817_s0, %s817_s0, %s818_s3  }
  0x23   :  { %809 = dma.done.wait [#allocation3], 128  }
  0x24   :  { %810 = vsyncadd [#allocation3], 4294967168 }
  0x25   :  { %811 = dma.done.wait [#allocation6], 512  }
  0x26   :  { %812 = vsyncadd [#allocation6], 4294966784  ;;  %v819_v0 = vmov 0.0|0.0   ;;  %vm820_vm0 = vmmov 0   ;;  %v821_v1 = vmov 0.0   ;;  %vm43_vm1 = vcmask 261120  }
  0x27   :  { %690 = vmatprep.subr.bf16.mxu1 %v819_v0  ;;  %708 = vmatprep.subr.bf16.mxu0 %v819_v0  ;;  %v39_v2 = vld [vmem:[#allocation5] sm:$0xff]  ;;  %v40_v3 = vld [vmem:[#allocation5 + $0x8] sm:$0xff]  ;;  %v41_v4 = vld [vmem:[#allocation5 + $0x10] sm:$0xff]  ;;  %v532_v41 = vlaneseq  ;;  %s822_s1 = smov [#allocation7]  }
  0x28   :  { %632 = vmatprep.mubr.msk.f32.mxu1 %vm820_vm0, %v821_v1  ;;  %665 = vmatprep.mubr.msk.f32.mxu0 %vm820_vm0, %v821_v1  ;;  %v48_v5 = vand.u32 4294901760, %v39_v2  ;;  %v51_v6 = vand.u32 4294901760, %v40_v3  ;;  %v42_v7 = vld [vmem:[#allocation5 + $0x18] sm:$0xff]  ;;  %v54_v8 = vand.u32 4294901760, %v41_v4  ;;  %s584_s6 = sshll.u32 %s822_s1, 4  ;;  %s585_s6 = int_to_ptr.vmem [resolvable:$true] %s584_s6 }
  0x29   :  { %v38_v9 = vld [vmem:[#allocation2] sm:$0xff]  ;;  %v57_v10 = vand.u32 4294901760, %v42_v7  ;;  %v533_v42 = vand.u32 127, %v532_v41  ;;  %s787_s7 = scalar_lea.vmem %s585_s6, 128  ;;  %p792_p3 = scmp.lt.s32.totalorder %s585_s6, %s585_s6 }
  0x2a   :  { %v45_v11 = vsel %vm43_vm1, %v38_v9, 0  ;;  %v691_v12 = vpack.c.bf16 %v51_v6, %v48_v5  ;;  %v128_v13 = vsub.f32 %v39_v2, %v48_v5  ;;  %v135_v14 = vsub.f32 %v40_v3, %v51_v6  ;;  %p788_p2 = scmp.ne.s32.totalorder %s585_s6, %s787_s7  ;;  %p793_p4 = scmp.lt.s32.totalorder %s787_s7, %s787_s7 }
  0x2b   :  { %v142_v15 = vsub.f32 %v41_v4, %v54_v8  ;;  %v149_v16 = vsub.f32 %v42_v7, %v57_v10  ;;  %v116_v17 = vand.u32 4294901760, %v45_v11  ;;  %v694_v18 = vpack.c.bf16 %v57_v10, %v54_v8 }
  0x2c   :  { %692 = vmatpush3.bf16.msra.mxu1 %v691_v12  ;;  %710 = vmatpush3.bf16.msra.mxu0 %v691_v12  ;;  %v129_v19 = vand.u32 4294901760, %v128_v13  ;;  %v136_v20 = vand.u32 4294901760, %v135_v14  ;;  %v703_v39 = vpack.c.bf16 %v135_v14, %v128_v13  ;;  %vm534_vm2 = vcmp.lt.s32.totalorder %v533_v42, 8  ;;  %p794_p5 = por %p793_p4, %p792_p3 }
  0x2d   :  { %v143_v21 = vand.u32 4294901760, %v142_v15  ;;  %693 = vmatprep.subr.bf16.mxu1 %v819_v0  ;;  %711 = vmatprep.subr.bf16.mxu0 %v819_v0  ;;  %v117_v22 = vsub.f32 %v45_v11, %v116_v17  ;;  %v150_v23 = vand.u32 4294901760, %v149_v16  ;;  %v706_v40 = vpack.c.bf16 %v149_v16, %v142_v15 }
  0x2e   :  { %v130_v24 = vsub.f32 %v128_v13, %v129_v19  ;;  %v137_v25 = vsub.f32 %v135_v14, %v136_v20  ;;  %v715_v31 = vpack.c.bf16 %v136_v20, %v129_v19  ;;  %p795_p6 = pnand %p794_p5, %p788_p2 }
  0x2f   :  { %v144_v26 = vsub.f32 %v142_v15, %v143_v21  ;;  %v118_v27 = vand.u32 4294901760, %v117_v22  ;;  %v151_v28 = vsub.f32 %v149_v16, %v150_v23  ;;  %v718_v37 = vpack.c.bf16 %v150_v23, %v143_v21 }
  0x30   :  { %695 = vmatpush3.bf16.msra.mxu1 %v694_v18  ;;  %713 = vmatpush3.bf16.msra.mxu0 %v694_v18  ;;  %v131_v29 = vand.u32 4294901760, %v130_v24  ;;  %v138_v30 = vand.u32 4294901760, %v137_v25 }
  0x31   :  { %v119_v32 = vsub.f32 %v117_v22, %v118_v27  ;;  %696 = vmatprep.subr.bf16.mxu1 %v819_v0  ;;  %714 = vmatprep.subr.bf16.mxu0 %v819_v0  ;;  %v145_v34 = vand.u32 4294901760, %v144_v26  ;;  %v152_v35 = vand.u32 4294901760, %v151_v28 }
  0x32   :  { %v697_v33 = vpack.c.bf16 %v138_v30, %v131_v29 }
  0x33   :  { %v120_v36 = vand.u32 4294901760, %v119_v32  ;;  %666 = vmatmul.mubr.f32.vlgmr.msra.gmra.mrb[0].mxu0 %v118_v27  ;;  %v700_v38 = vpack.c.bf16 %v152_v35, %v145_v34 }
  0x34   :  { %716 = vmatpush3.bf16.msra.mxu0 %v715_v31  ;;  %676 = vmatprep.mubr.msk.f32.mxu0 %vm820_vm0, %v821_v1 }
  0x35   :  { %633 = vmatmul.mubr.f32.vlgmr.msra.gmra.mrb[0].mxu1 %v120_v36  ;;  %717 = vmatprep.subr.bf16.mxu0 %v819_v0 }
  0x36   :  { %698 = vmatpush3.bf16.msra.mxu1 %v697_v33  ;;  %643 = vmatprep.mubr.msk.f32.mxu1 %vm820_vm0, %v821_v1 }
  0x37   :  { %699 = vmatprep.subr.bf16.mxu1 %v819_v0 }
  0x38   :  { %719 = vmatpush3.bf16.msra.mxu0 %v718_v37 }
  0x39   :  { %720 = vmatprep.subr.bf16.mxu0 %v819_v0 }
  0x3a   :  { %701 = vmatpush3.bf16.msra.mxu1 %v700_v38 }
  0x3b   :  { %702 = vmatprep.subr.bf16.mxu1 %v819_v0  ;;  %677 = vmatmul.mubr.f32.vlgmr.msra.gmra.mrb[0].mxu0 %v116_v17 }
  0x3c   :  { %722 = vmatpush3.bf16.msra.mxu0 %v691_v12  ;;  %687 = vmatprep.mubr.msk.f32.mxu0 %vm820_vm0, %v821_v1 }
  0x3d   :  { %644 = vmatmul.mubr.f32.vlgmr.msra.gmra.mrb[0].mxu1 %v116_v17  ;;  %723 = vmatprep.subr.bf16.mxu0 %v819_v0 }
  0x3e   :  { %704 = vmatpush3.bf16.msra.mxu1 %v703_v39  ;;  %654 = vmatprep.mubr.msk.f32.mxu1 %vm820_vm0, %v821_v1 }
  0x3f   :  { %705 = vmatprep.subr.bf16.mxu1 %v819_v0 }
  0x40   :  { %725 = vmatpush3.bf16.msra.mxu0 %v694_v18 }
  0x42   :  { %707 = vmatpush3.bf16.msra.mxu1 %v706_v40 }
  0x43   :  { %688 = vmatmul.mubr.f32.vlgmr.msra.gmra.mrb[0].mxu0 %v116_v17 }
  0x45   :  { %655 = vmatmul.mubr.f32.vlgmr.msra.gmra.mrb[0].mxu1 %v117_v22 }
 0x116   :  { %v528_v43 = vpop.f32.mrb[0].mxu0 }
 0x117   :  { %v689_v44 = vpop.f32.mrb[1].mxu0 }
 0x118   :  { %v293_v45 = vpop.f32.mrb[0].mxu1 }
 0x119   :  { %v726_v46 = vadd.f32 %v528_v43, %v293_v45  ;;  %v656_v47 = vpop.f32.mrb[1].mxu1 }
 0x11b   :  { %v535_v48 = vsel %vm534_vm2, %v726_v46, -inf }
 0x11c   :  { %536 = vmax.xlane.f32.xlu0 %v535_v48 }
 0x1a9   :  { %v537_v49 = vpop.xlane.xlu0 %536 }
 0x1aa   :  { %vm538_vm3 = vcmp.eq.f32.partialorder %v535_v48, %v537_v49 }
 0x1ab   :  { %v539_v50 = vsel %vm538_vm3, %v533_v42, 128 }
 0x1ac   :  { %v541_v51 = vshra.s32 %v539_v50, 16  ;;  %v540_v53 = vand.u32 65535, %v539_v50 }
 0x1ae   :  { %v543_v52 = vcvt.s32.f32 %v541_v51  ;;  %v542_v55 = vcvt.s32.f32 %v540_v53 }
 0x1b0   :  { %544 = vmin.xlane.f32.xlu0 %v543_v52 }
 0x23d   :  { %v545_v54 = vpop.xlane.xlu0 %544 }
 0x23e   :  { %vm546_vm4 = vcmp.eq.f32.partialorder %v543_v52, %v545_v54  ;;  %v551_v57 = vcvt.f32.s32 %v545_v54 }
 0x23f   :  { %v547_v56 = vsel %vm546_vm4, %v542_v55, inf }
 0x240   :  { %548 = vmin.xlane.f32.xlu1 %v547_v56  ;;  %v552_v59 = vshll.u32 %v551_v57, 16 }
 0x2cd   :  { %v549_v58 = vpop.xlane.xlu1 %548 }
 0x2ce   :  { %v550_v60 = vcvt.f32.s32 %v549_v58 }
 0x2d0   :  { %v553_v61 = vadd.s32 %v552_v59, %v550_v60 }
 0x2d2   :  { %vm554_vm5 = vcmp.eq.s32.totalorder %v533_v42, %v553_v61 }
 0x2d3   :  { %v556_v62 = vsel %vm554_vm5, -inf, %v535_v48  ;;  %v555_v13 = vsel %vm554_vm5, 1.0, %v821_v1 }
 0x2d4   :  { %557 = vmax.xlane.f32.xlu1 %v556_v62 }
 0x361   :  { %v558_v63 = vpop.xlane.xlu1 %557 }
 0x362   :  { %vm559_vm6 = vcmp.eq.f32.partialorder %v556_v62, %v558_v63 }
 0x363   :  { %v560_v0 = vsel %vm559_vm6, %v533_v42, 128 }
 0x364   :  { %v562_v2 = vshra.s32 %v560_v0, 16  ;;  %v561_v4 = vand.u32 65535, %v560_v0 }
 0x366   :  { %v564_v3 = vcvt.s32.f32 %v562_v2  ;;  %v563_v6 = vcvt.s32.f32 %v561_v4 }
 0x368   :  { %565 = vmin.xlane.f32.xlu0 %v564_v3 }
 0x3f5   :  { %v566_v5 = vpop.xlane.xlu0 %565 }
 0x3f6   :  { %vm567_vm7 = vcmp.eq.f32.partialorder %v564_v3, %v566_v5  ;;  %v572_v8 = vcvt.f32.s32 %v566_v5 }
 0x3f7   :  { %v568_v7 = vsel %vm567_vm7, %v563_v6, inf }
 0x3f8   :  { %569 = vmin.xlane.f32.xlu1 %v568_v7  ;;  %v573_v10 = vshll.u32 %v572_v8, 16 }
 0x485   :  { %v570_v9 = vpop.xlane.xlu1 %569 }
 0x486   :  { %v571_v11 = vcvt.f32.s32 %v570_v9 }
 0x488   :  { %v574_v12 = vadd.s32 %v573_v10, %v571_v11 }
 0x48a   :  { %vm575_vm8 = vcmp.eq.s32.totalorder %v533_v42, %v574_v12 }
 0x48b   :  { %v576_v14 = vsel %vm575_vm8, 1.0, %v555_v13 }
 0x48c   :  { %577 = vst [vmem:[#allocation7] sm:$0xff] %v576_v14 }
 0x48d   :  { %798 = shalt.err (!%p795_p6)
}
 0x48e   :  { %s799_s10 = scalar_lea.hbm %s910_s2, 128 }
 0x48f   :  { %p800_p7 = scmp.ne.s32.totalorder %s910_s2, %s799_s10  ;;  %p803_p8 = scmp.lt.u32.totalorder %s799_s10, %s910_s2 }
 0x491   :  { %p805_p9 = pnand %p803_p8, %p800_p7 }
 0x493   :  { %808 = shalt.err (!%p805_p9)
}
 0x494   :  { %587 = dma.vmem_to_hbm [thread:$0]  %s585_s6, 128, %s910_s2, [#allocation4]  }
 0x495   :  { %813 = dma.done.wait [#allocation4], 128  }
 0x496   :  { %814 = vsyncadd [#allocation4], 4294967168 }
 0x497   :  { %591 = vsyncpa [#allocation3], 1 }
 0x498   :  { %592 = vsyncpa [#allocation6], 1 }
 0x499   :  { %593 = vsyncpa [#allocation4], 1 }

// kernel: tpu_custom_call.1
= control target key start
LH: loop header
LB: loop body
LE: loop exit
PB: predicated region body
PF: predicated region fallthrough
CT: control target
= control target key end

     0   :  { %7 = vsyncpa [#allocation3], 0  ;;  %s908_s0 = inlined_call_operand.hbm [shape: f32[8,32], index: 0, kind: input, shape index: {}]   ;;  %s909_s1 = inlined_call_operand.hbm [shape: f32[32,128], index: 1, kind: input, shape index: {}]   ;;  %s910_s2 = inlined_call_operand.hbm [shape: f32[8,128], index: 2, kind: output, shape index: {}]  }
   0x1   :  { %8 = vsyncpa [#allocation6], 0 }
   0x2   :  { %9 = vsyncpa [#allocation4], 0  ;;  %s815_s9 = smov [#allocation2]   ;;  %s816_s11 = smov [#allocation5]  }
   0x3   :  { %s16_s10 = sshll.u32 %s815_s9, 4  ;;  %s25_s12 = sshll.u32 %s816_s11, 4  ;;  %s17_s10 = int_to_ptr.vmem [resolvable:$true] %s16_s10  ;;  %s838_s12 = int_to_ptr.vmem [resolvable:$true] %s25_s12 }
   0x4   :  { %s743_s15 = scalar_lea.hbm %s908_s0, 128 }
   0x5   :  { %p744_p0 = scmp.ne.s32.totalorder %s908_s0, %s743_s15  ;;  %p747_p1 = scmp.lt.u32.totalorder %s743_s15, %s908_s0 }
   0x7   :  { %p749_p2 = pnand %p747_p1, %p744_p0 }
   0x9   :  { %752 = shalt.err (!%p749_p2)
}
   0xa   :  { %s753_s20 = scalar_lea.vmem %s17_s10, 128  ;;  %p758_p4 = scmp.lt.s32.totalorder %s17_s10, %s17_s10 }
   0xb   :  { %p754_p3 = scmp.ne.s32.totalorder %s17_s10, %s753_s20  ;;  %p759_p5 = scmp.lt.s32.totalorder %s753_s20, %s753_s20 }
   0xd   :  { %p760_p6 = por %p759_p5, %p758_p4 }
   0xf   :  { %p761_p7 = pnand %p760_p6, %p754_p3 }
  0x11   :  { %764 = shalt.err (!%p761_p7)
}
  0x12   :  { %19 = dma.hbm_to_vmem [thread:$0]  %s908_s0, 128, %s17_s10, [#allocation3]  }
  0x13   :  { %s765_s25 = scalar_lea.hbm %s909_s1, 512 }
  0x14   :  { %p766_p8 = scmp.ne.s32.totalorder %s909_s1, %s765_s25  ;;  %p769_p9 = scmp.lt.u32.totalorder %s765_s25, %s909_s1 }
  0x16   :  { %p771_p10 = pnand %p769_p9, %p766_p8 }
  0x18   :  { %774 = shalt.err (!%p771_p10)
}
  0x19   :  { %s775_s30 = scalar_lea.vmem %s838_s12, 512  ;;  %p780_p12 = scmp.lt.s32.totalorder %s838_s12, %s838_s12 }
  0x1a   :  { %p776_p11 = scmp.ne.s32.totalorder %s838_s12, %s775_s30  ;;  %p781_p13 = scmp.lt.s32.totalorder %s775_s30, %s775_s30 }
  0x1c   :  { %p782_p0 = por %p781_p13, %p780_p12 }
  0x1e   :  { %p783_p1 = pnand %p782_p0, %p776_p11 }
  0x20   :  { %786 = shalt.err (!%p783_p1)
}
  0x21   :  { %s817_s0 = smov 128   ;;  %s818_s3 = smov 8  }
  0x22   :  { %31 = dma.hbm_to_vmem [thread:$0]  %s909_s1, 512, %s838_s12, [#allocation6], %s817_s0, %s817_s0, %s818_s3  }
  0x23   :  { %809 = dma.done.wait [#allocation3], 128  }
  0x24   :  { %810 = vsyncadd [#allocation3], 4294967168 }
  0x25   :  { %811 = dma.done.wait [#allocation6], 512  }
  0x26   :  { %812 = vsyncadd [#allocation6], 4294966784  ;;  %v819_v0 = vmov 0.0|0.0   ;;  %vm820_vm0 = vmmov 0   ;;  %v821_v1 = vmov 0.0   ;;  %vm43_vm1 = vcmask 261120  }
  0x27   :  { %690 = vmatprep.subr.bf16.mxu1 %v819_v0  ;;  %708 = vmatprep.subr.bf16.mxu0 %v819_v0  ;;  %v39_v2 = vld [vmem:[#allocation5] sm:$0xff]  ;;  %v40_v3 = vld [vmem:[#allocation5 + $0x8] sm:$0xff]  ;;  %v41_v4 = vld [vmem:[#allocation5 + $0x10] sm:$0xff]  ;;  %v532_v41 = vlaneseq  ;;  %s822_s1 = smov [#allocation7]  }
  0x28   :  { %632 = vmatprep.mubr.msk.f32.mxu1 %vm820_vm0, %v821_v1  ;;  %665 = vmatprep.mubr.msk.f32.mxu0 %vm820_vm0, %v821_v1  ;;  %v48_v5 = vand.u32 4294901760, %v39_v2  ;;  %v51_v6 = vand.u32 4294901760, %v40_v3  ;;  %v42_v7 = vld [vmem:[#allocation5 + $0x18] sm:$0xff]  ;;  %v54_v8 = vand.u32 4294901760, %v41_v4  ;;  %s584_s6 = sshll.u32 %s822_s1, 4  ;;  %s585_s6 = int_to_ptr.vmem [resolvable:$true] %s584_s6 }
  0x29   :  { %v38_v9 = vld [vmem:[#allocation2] sm:$0xff]  ;;  %v57_v10 = vand.u32 4294901760, %v42_v7  ;;  %v533_v42 = vand.u32 127, %v532_v41  ;;  %s787_s7 = scalar_lea.vmem %s585_s6, 128  ;;  %p792_p3 = scmp.lt.s32.totalorder %s585_s6, %s585_s6 }
  0x2a   :  { %v45_v11 = vsel %vm43_vm1, %v38_v9, 0  ;;  %v691_v12 = vpack.c.bf16 %v51_v6, %v48_v5  ;;  %v128_v13 = vsub.f32 %v39_v2, %v48_v5  ;;  %v135_v14 = vsub.f32 %v40_v3, %v51_v6  ;;  %p788_p2 = scmp.ne.s32.totalorder %s585_s6, %s787_s7  ;;  %p793_p4 = scmp.lt.s32.totalorder %s787_s7, %s787_s7 }
  0x2b   :  { %v142_v15 = vsub.f32 %v41_v4, %v54_v8  ;;  %v149_v16 = vsub.f32 %v42_v7, %v57_v10  ;;  %v116_v17 = vand.u32 4294901760, %v45_v11  ;;  %v694_v18 = vpack.c.bf16 %v57_v10, %v54_v8 }
  0x2c   :  { %692 = vmatpush3.bf16.msra.mxu1 %v691_v12  ;;  %710 = vmatpush3.bf16.msra.mxu0 %v691_v12  ;;  %v129_v19 = vand.u32 4294901760, %v128_v13  ;;  %v136_v20 = vand.u32 4294901760, %v135_v14  ;;  %v703_v39 = vpack.c.bf16 %v135_v14, %v128_v13  ;;  %vm534_vm2 = vcmp.lt.s32.totalorder %v533_v42, 8  ;;  %p794_p5 = por %p793_p4, %p792_p3 }
  0x2d   :  { %v143_v21 = vand.u32 4294901760, %v142_v15  ;;  %693 = vmatprep.subr.bf16.mxu1 %v819_v0  ;;  %711 = vmatprep.subr.bf16.mxu0 %v819_v0  ;;  %v117_v22 = vsub.f32 %v45_v11, %v116_v17  ;;  %v150_v23 = vand.u32 4294901760, %v149_v16  ;;  %v706_v40 = vpack.c.bf16 %v149_v16, %v142_v15 }
  0x2e   :  { %v130_v24 = vsub.f32 %v128_v13, %v129_v19  ;;  %v137_v25 = vsub.f32 %v135_v14, %v136_v20  ;;  %v715_v31 = vpack.c.bf16 %v136_v20, %v129_v19  ;;  %p795_p6 = pnand %p794_p5, %p788_p2 }
  0x2f   :  { %v144_v26 = vsub.f32 %v142_v15, %v143_v21  ;;  %v118_v27 = vand.u32 4294901760, %v117_v22  ;;  %v151_v28 = vsub.f32 %v149_v16, %v150_v23  ;;  %v718_v37 = vpack.c.bf16 %v150_v23, %v143_v21 }
  0x30   :  { %695 = vmatpush3.bf16.msra.mxu1 %v694_v18  ;;  %713 = vmatpush3.bf16.msra.mxu0 %v694_v18  ;;  %v131_v29 = vand.u32 4294901760, %v130_v24  ;;  %v138_v30 = vand.u32 4294901760, %v137_v25 }
  0x31   :  { %v119_v32 = vsub.f32 %v117_v22, %v118_v27  ;;  %696 = vmatprep.subr.bf16.mxu1 %v819_v0  ;;  %714 = vmatprep.subr.bf16.mxu0 %v819_v0  ;;  %v145_v34 = vand.u32 4294901760, %v144_v26  ;;  %v152_v35 = vand.u32 4294901760, %v151_v28 }
  0x32   :  { %v697_v33 = vpack.c.bf16 %v138_v30, %v131_v29 }
  0x33   :  { %v120_v36 = vand.u32 4294901760, %v119_v32  ;;  %666 = vmatmul.mubr.f32.vlgmr.msra.gmra.mrb[0].mxu0 %v118_v27  ;;  %v700_v38 = vpack.c.bf16 %v152_v35, %v145_v34 }
  0x34   :  { %716 = vmatpush3.bf16.msra.mxu0 %v715_v31  ;;  %676 = vmatprep.mubr.msk.f32.mxu0 %vm820_vm0, %v821_v1 }
  0x35   :  { %633 = vmatmul.mubr.f32.vlgmr.msra.gmra.mrb[0].mxu1 %v120_v36  ;;  %717 = vmatprep.subr.bf16.mxu0 %v819_v0 }
  0x36   :  { %698 = vmatpush3.bf16.msra.mxu1 %v697_v33  ;;  %643 = vmatprep.mubr.msk.f32.mxu1 %vm820_vm0, %v821_v1 }
  0x37   :  { %699 = vmatprep.subr.bf16.mxu1 %v819_v0 }
  0x38   :  { %719 = vmatpush3.bf16.msra.mxu0 %v718_v37 }
  0x39   :  { %720 = vmatprep.subr.bf16.mxu0 %v819_v0 }
  0x3a   :  { %701 = vmatpush3.bf16.msra.mxu1 %v700_v38 }
  0x3b   :  { %702 = vmatprep.subr.bf16.mxu1 %v819_v0  ;;  %677 = vmatmul.mubr.f32.vlgmr.msra.gmra.mrb[0].mxu0 %v116_v17 }
  0x3c   :  { %722 = vmatpush3.bf16.msra.mxu0 %v691_v12  ;;  %687 = vmatprep.mubr.msk.f32.mxu0 %vm820_vm0, %v821_v1 }
  0x3d   :  { %644 = vmatmul.mubr.f32.vlgmr.msra.gmra.mrb[0].mxu1 %v116_v17  ;;  %723 = vmatprep.subr.bf16.mxu0 %v819_v0 }
  0x3e   :  { %704 = vmatpush3.bf16.msra.mxu1 %v703_v39  ;;  %654 = vmatprep.mubr.msk.f32.mxu1 %vm820_vm0, %v821_v1 }
  0x3f   :  { %705 = vmatprep.subr.bf16.mxu1 %v819_v0 }
  0x40   :  { %725 = vmatpush3.bf16.msra.mxu0 %v694_v18 }
  0x42   :  { %707 = vmatpush3.bf16.msra.mxu1 %v706_v40 }
  0x43   :  { %688 = vmatmul.mubr.f32.vlgmr.msra.gmra.mrb[0].mxu0 %v116_v17 }
  0x45   :  { %655 = vmatmul.mubr.f32.vlgmr.msra.gmra.mrb[0].mxu1 %v117_v22 }
 0x116   :  { %v528_v43 = vpop.f32.mrb[0].mxu0 }
 0x117   :  { %v689_v44 = vpop.f32.mrb[1].mxu0 }
 0x118   :  { %v293_v45 = vpop.f32.mrb[0].mxu1 }
 0x119   :  { %v726_v46 = vadd.f32 %v528_v43, %v293_v45  ;;  %v656_v47 = vpop.f32.mrb[1].mxu1 }
 0x11b   :  { %v535_v48 = vsel %vm534_vm2, %v726_v46, -inf }
 0x11c   :  { %536 = vmax.xlane.f32.xlu0 %v535_v48 }
 0x1a9   :  { %v537_v49 = vpop.xlane.xlu0 %536 }
 0x1aa   :  { %vm538_vm3 = vcmp.eq.f32.partialorder %v535_v48, %v537_v49 }
 0x1ab   :  { %v539_v50 = vsel %vm538_vm3, %v533_v42, 128 }
 0x1ac   :  { %v541_v51 = vshra.s32 %v539_v50, 16  ;;  %v540_v53 = vand.u32 65535, %v539_v50 }
 0x1ae   :  { %v543_v52 = vcvt.s32.f32 %v541_v51  ;;  %v542_v55 = vcvt.s32.f32 %v540_v53 }
 0x1b0   :  { %544 = vmin.xlane.f32.xlu0 %v543_v52 }
 0x23d   :  { %v545_v54 = vpop.xlane.xlu0 %544 }
 0x23e   :  { %vm546_vm4 = vcmp.eq.f32.partialorder %v543_v52, %v545_v54  ;;  %v551_v57 = vcvt.f32.s32 %v545_v54 }
 0x23f   :  { %v547_v56 = vsel %vm546_vm4, %v542_v55, inf }
 0x240   :  { %548 = vmin.xlane.f32.xlu1 %v547_v56  ;;  %v552_v59 = vshll.u32 %v551_v57, 16 }
 0x2cd   :  { %v549_v58 = vpop.xlane.xlu1 %548 }
 0x2ce   :  { %v550_v60 = vcvt.f32.s32 %v549_v58 }
 0x2d0   :  { %v553_v61 = vadd.s32 %v552_v59, %v550_v60 }
 0x2d2   :  { %vm554_vm5 = vcmp.eq.s32.totalorder %v533_v42, %v553_v61 }
 0x2d3   :  { %v556_v62 = vsel %vm554_vm5, -inf, %v535_v48  ;;  %v555_v13 = vsel %vm554_vm5, 1.0, %v821_v1 }
 0x2d4   :  { %557 = vmax.xlane.f32.xlu1 %v556_v62 }
 0x361   :  { %v558_v63 = vpop.xlane.xlu1 %557 }
 0x362   :  { %vm559_vm6 = vcmp.eq.f32.partialorder %v556_v62, %v558_v63 }
 0x363   :  { %v560_v0 = vsel %vm559_vm6, %v533_v42, 128 }
 0x364   :  { %v562_v2 = vshra.s32 %v560_v0, 16  ;;  %v561_v4 = vand.u32 65535, %v560_v0 }
 0x366   :  { %v564_v3 = vcvt.s32.f32 %v562_v2  ;;  %v563_v6 = vcvt.s32.f32 %v561_v4 }
 0x368   :  { %565 = vmin.xlane.f32.xlu0 %v564_v3 }
 0x3f5   :  { %v566_v5 = vpop.xlane.xlu0 %565 }
 0x3f6   :  { %vm567_vm7 = vcmp.eq.f32.partialorder %v564_v3, %v566_v5  ;;  %v572_v8 = vcvt.f32.s32 %v566_v5 }
 0x3f7   :  { %v568_v7 = vsel %vm567_vm7, %v563_v6, inf }
 0x3f8   :  { %569 = vmin.xlane.f32.xlu1 %v568_v7  ;;  %v573_v10 = vshll.u32 %v572_v8, 16 }
 0x485   :  { %v570_v9 = vpop.xlane.xlu1 %569 }
 0x486   :  { %v571_v11 = vcvt.f32.s32 %v570_v9 }
 0x488   :  { %v574_v12 = vadd.s32 %v573_v10, %v571_v11 }
 0x48a   :  { %vm575_vm8 = vcmp.eq.s32.totalorder %v533_v42, %v574_v12 }
 0x48b   :  { %v576_v14 = vsel %vm575_vm8, 1.0, %v555_v13 }
 0x48c   :  { %577 = vst [vmem:[#allocation7] sm:$0xff] %v576_v14 }
 0x48d   :  { %798 = shalt.err (!%p795_p6)
}
 0x48e   :  { %s799_s10 = scalar_lea.hbm %s910_s2, 128 }
 0x48f   :  { %p800_p7 = scmp.ne.s32.totalorder %s910_s2, %s799_s10  ;;  %p803_p8 = scmp.lt.u32.totalorder %s799_s10, %s910_s2 }
 0x491   :  { %p805_p9 = pnand %p803_p8, %p800_p7 }
 0x493   :  { %808 = shalt.err (!%p805_p9)
}
 0x494   :  { %587 = dma.vmem_to_hbm [thread:$0]  %s585_s6, 128, %s910_s2, [#allocation4]  }
 0x495   :  { %813 = dma.done.wait [#allocation4], 128  }
 0x496   :  { %814 = vsyncadd [#allocation4], 4294967168 }
 0x497   :  { %591 = vsyncpa [#allocation3], 1 }
 0x498   :  { %592 = vsyncpa [#allocation6], 1 }
 0x499   :  { %593 = vsyncpa [#allocation4], 1 }

</bundles_post_ra>
